<compile_context>
chip_gen: v7x
topology: tpu7x:2x2x1
jax: 0.10.0
libtpu: 0.0.40
codegen_flags: <defaults>
</compile_context>

<pallas_src>
import math
from functools import partial

import jax
import jax.numpy as jnp
from jax import lax
from jax.experimental import pallas as pl
from jax.experimental.pallas import tpu as pltpu


def _mhsa_kernel(x_ref, wqkv_ref, o_ref, *, num_heads, head_dim):
    # x_ref:    (1, S, E)     — one batch element
    # wqkv_ref: (E, 3*H*Dh)   — all heads' Q|K|V projections stacked along columns
    # o_ref:    (1, S, H*Dh)  — concat-head output, written with one dense store
    x = x_ref[0]                                   # (S, E)
    S = x.shape[0]
    A = num_heads * head_dim

    # Single fused projection: Q, K, V for every head in one MXU matmul.
    qkv = jnp.dot(x, wqkv_ref[...], preferred_element_type=jnp.float32)   # (S, 3A)

    # Fold the 1/sqrt(Dh) scale into q.
    q = qkv[:, :A] * (1.0 / math.sqrt(head_dim))
    k = qkv[:, A:2 * A]
    v = qkv[:, 2 * A:]

    # Causal mask (col <= row). -inf is safe here: every row keeps >= 1 unmasked entry.
    row = lax.broadcasted_iota(jnp.int32, (S, S), 0)
    col = lax.broadcasted_iota(jnp.int32, (S, S), 1)
    causal = col <= row

    dn = (((1,), (1,)), ((), ()))   # contract dim 1 of both operands == q @ k^T, no transpose
    outs = []
    for h in range(num_heads):      # static unroll; per-head contraction over Dh
        sl = slice(h * head_dim, (h + 1) * head_dim)
        s = lax.dot_general(q[:, sl], k[:, sl], dn,
                            preferred_element_type=jnp.float32)           # (S, S)
        s = jnp.where(causal, s, -jnp.inf)
        m = jnp.max(s, axis=-1, keepdims=True)
        p = jnp.exp(s - m)
        # exact reciprocal: approx=True could flip values at the 1e-4 rounding boundary
        attn = p * pl.reciprocal(jnp.sum(p, axis=-1, keepdims=True), approx=False)
        outs.append(jnp.dot(attn, v[:, sl], preferred_element_type=jnp.float32))

    out = jnp.concatenate(outs, axis=-1)           # (S, A) == torch.cat(head_outputs, dim=2)
    out = jnp.round(out * 1e4) * 1e-4              # torch.round(..., decimals=4), half-to-even
    o_ref[0] = out.astype(o_ref.dtype)


def multi_headed_self_attention(embedded, wq, wk, wv):
    """embedded: [B, S, E]; wq/wk/wv: [H, E, Dh] (x @ W layout). Returns [B, S, H*Dh]."""
    B, S, E = embedded.shape
    H, _, Dh = wq.shape
    A = H * Dh

    # One-time weight layout transform (outside the kernel): stack per-head weights into a
    # single (E, 3*A) matrix with columns [Q heads | K heads | V heads].
    def stack(w):
        return jnp.transpose(w, (1, 0, 2)).reshape(E, A)
    wqkv = jnp.concatenate([stack(wq), stack(wk), stack(wv)], axis=1)     # (E, 3A)

    return pl.pallas_call(
        partial(_mhsa_kernel, num_heads=H, head_dim=Dh),
        out_shape=jax.ShapeDtypeStruct((B, S, A), embedded.dtype),
        grid_spec=pltpu.PrefetchScalarGridSpec(
            num_scalar_prefetch=0,
            grid=(B,),
            in_specs=[
                pl.BlockSpec((1, S, E), lambda b: (b, 0, 0)),     # x: one DMA per batch elem
                pl.BlockSpec((E, 3 * A), lambda b: (0, 0)),       # weights: same block every step
            ],
            out_specs=pl.BlockSpec((1, S, A), lambda b: (b, 0, 0)),
        ),
        compiler_params=pltpu.CompilerParams(
            dimension_semantics=("parallel",)),   # B>=2 keeps both v7x TensorCores busy
    )(embedded, wqkv)


def _reference(embedded, wq, wk, wv):
    """Pure-JAX reference (mirrors the PyTorch forward)."""
    B, S, E = embedded.shape
    H, _, Dh = wq.shape
    outs = []
    tril = jnp.tril(jnp.ones((S, S), dtype=bool))
    for h in range(H):
        q = embedded @ wq[h]
        k = embedded @ wk[h]
        v = embedded @ wv[h]
        scores = (q @ jnp.swapaxes(k, 1, 2)) / math.sqrt(Dh)
        scores = jnp.where(tril, scores, -jnp.inf)
        attn = jax.nn.softmax(scores, axis=-1)
        outs.append(attn @ v)
    out = jnp.concatenate(outs, axis=2)
    return jnp.round(out * 1e4) * 1e-4


if __name__ == "__main__":
    # Small shapes consistent with the module's forward.
    B, S = 2, 8
    embedding_dim = 32
    attention_dim = 32
    num_heads = 4
    head_dim = attention_dim // num_heads

    key = jax.random.PRNGKey(0)
    kx, kq, kk, kv = jax.random.split(key, 4)

    embedded = jax.random.normal(kx, (B, S, embedding_dim), dtype=jnp.float32)

    # Deterministic init. NOTE: the PyTorch module calls torch.manual_seed(0) in every
    # SingleHeadAttention.__init__, so all heads share identical weights; we reproduce
    # that quirk by generating one weight set and tiling it across heads.
    bound = 1.0 / math.sqrt(embedding_dim)  # nn.Linear default uniform bound
    wq1 = jax.random.uniform(kq, (embedding_dim, head_dim), jnp.float32, -bound, bound)
    wk1 = jax.random.uniform(kk, (embedding_dim, head_dim), jnp.float32, -bound, bound)
    wv1 = jax.random.uniform(kv, (embedding_dim, head_dim), jnp.float32, -bound, bound)
    wq = jnp.tile(wq1[None], (num_heads, 1, 1))
    wk = jnp.tile(wk1[None], (num_heads, 1, 1))
    wv = jnp.tile(wv1[None], (num_heads, 1, 1))

    out = multi_headed_self_attention(embedded, wq, wk, wv)
    out = jax.block_until_ready(out)

    ref = _reference(embedded, wq, wk, wv)
    assert out.shape == (B, S, attention_dim), out.shape
    assert jnp.allclose(out, ref, atol=1e-5, rtol=1e-5), "mismatch vs reference"

    print("KERNEL_OK")
</pallas_src>

<mosaic_0001>
module attributes {stable_mosaic.version = 11 : i64} {
  func.func @_mhsa_kernel(%arg0: i32, %arg1: memref<1x8x32xf32, #tpu.memory_space<vmem>>, %arg2: memref<32x96xf32, #tpu.memory_space<vmem>>, %arg3: memref<1x8x32xf32, #tpu.memory_space<vmem>>) attributes {dimension_semantics = [#tpu.dimension_semantics<parallel>], iteration_bounds = array<i64: 2>, scalar_prefetch = 0 : i64, scratch_operands = 0 : i64, tpu.core_type = #tpu.core_type<tc>, window_params = [{transform_indices = @transform_0, window_bounds = array<i64: 1, 8, 32>}, {pipeline_mode = #tpu.pipeline_mode<synchronous>, transform_indices = @transform_1, window_bounds = array<i64: 32, 96>}, {transform_indices = @transform_2, window_bounds = array<i64: 1, 8, 32>}]} {
    %c0 = arith.constant 0 : index
    %c0_0 = arith.constant 0 : index
    %c0_1 = arith.constant 0 : index
    %0 = vector.load %arg1[%c0, %c0_0, %c0_1] : memref<1x8x32xf32, #tpu.memory_space<vmem>>, vector<1x8x32xf32>
    %1 = vector.shape_cast %0 : vector<1x8x32xf32> to vector<8x32xf32>
    %c0_2 = arith.constant 0 : index
    %c0_3 = arith.constant 0 : index
    %2 = vector.load %arg2[%c0_2, %c0_3] : memref<32x96xf32, #tpu.memory_space<vmem>>, vector<32x96xf32>
    %cst = arith.constant dense<0.000000e+00> : vector<8x96xf32>
    %3 = tpu.matmul %1, %2, %cst {dimension_numbers = #tpu.dot_dimension_numbers<[1], [0], [0], [1], [0, 0, 1, 1], [], []>} : vector<8x32xf32>, vector<32x96xf32>, vector<8x96xf32> -> vector<8x96xf32>
    %4 = vector.extract_strided_slice %3 {offsets = [0, 0], sizes = [8, 32], strides = [1, 1]} : vector<8x96xf32> to vector<8x32xf32>
    %cst_4 = arith.constant 0.353553385 : f32
    %5 = vector.broadcast %cst_4 : f32 to vector<8x32xf32>
    %6 = arith.mulf %4, %5 : vector<8x32xf32>
    %7 = vector.extract_strided_slice %3 {offsets = [0, 32], sizes = [8, 32], strides = [1, 1]} : vector<8x96xf32> to vector<8x32xf32>
    %8 = vector.extract_strided_slice %3 {offsets = [0, 64], sizes = [8, 32], strides = [1, 1]} : vector<8x96xf32> to vector<8x32xf32>
    %9 = tpu.iota {dimensions = array<i32: 0>} : vector<8x8xi32>
    %10 = tpu.iota {dimensions = array<i32: 1>} : vector<8x8xi32>
    %11 = arith.cmpi sle, %10, %9 : vector<8x8xi32>
    %12 = vector.extract_strided_slice %6 {offsets = [0, 0], sizes = [8, 8], strides = [1, 1]} : vector<8x32xf32> to vector<8x8xf32>
    %13 = vector.extract_strided_slice %7 {offsets = [0, 0], sizes = [8, 8], strides = [1, 1]} : vector<8x32xf32> to vector<8x8xf32>
    %cst_5 = arith.constant dense<0.000000e+00> : vector<8x8xf32>
    %14 = tpu.matmul %12, %13, %cst_5 {dimension_numbers = #tpu.dot_dimension_numbers<[1], [1], [0], [0], [0, 0, 1, 0], [], []>} : vector<8x8xf32>, vector<8x8xf32>, vector<8x8xf32> -> vector<8x8xf32>
    %cst_6 = arith.constant 0xFF800000 : f32
    %15 = vector.broadcast %cst_6 : f32 to vector<8x8xf32>
    %16 = arith.select %11, %14, %15 : vector<8x8xi1>, vector<8x8xf32>
    %cst_7 = arith.constant dense<0xFF800000> : vector<8xf32>
    %17 = vector.multi_reduction <maximumf>, %16, %cst_7 [1] : vector<8x8xf32> to vector<8xf32>
    %18 = vector.shape_cast %17 : vector<8xf32> to vector<8x1xf32>
    %19 = vector.broadcast %18 : vector<8x1xf32> to vector<8x8xf32>
    %20 = arith.subf %16, %19 : vector<8x8xf32>
    %21 = math.exp %20 : vector<8x8xf32>
    %cst_8 = arith.constant dense<0.000000e+00> : vector<8xf32>
    %22 = vector.multi_reduction <add>, %21, %cst_8 [1] : vector<8x8xf32> to vector<8xf32>
    %23 = vector.shape_cast %22 : vector<8xf32> to vector<8x1xf32>
    %24 = tpu.reciprocal %23 : vector<8x1xf32> -> vector<8x1xf32>
    %25 = vector.broadcast %24 : vector<8x1xf32> to vector<8x8xf32>
    %26 = arith.mulf %21, %25 : vector<8x8xf32>
    %27 = vector.extract_strided_slice %8 {offsets = [0, 0], sizes = [8, 8], strides = [1, 1]} : vector<8x32xf32> to vector<8x8xf32>
    %cst_9 = arith.constant dense<0.000000e+00> : vector<8x8xf32>
    %28 = tpu.matmul %26, %27, %cst_9 {dimension_numbers = #tpu.dot_dimension_numbers<[1], [0], [0], [1], [0, 0, 1, 1], [], []>} : vector<8x8xf32>, vector<8x8xf32>, vector<8x8xf32> -> vector<8x8xf32>
    %29 = vector.extract_strided_slice %6 {offsets = [0, 8], sizes = [8, 8], strides = [1, 1]} : vector<8x32xf32> to vector<8x8xf32>
    %30 = vector.extract_strided_slice %7 {offsets = [0, 8], sizes = [8, 8], strides = [1, 1]} : vector<8x32xf32> to vector<8x8xf32>
    %cst_10 = arith.constant dense<0.000000e+00> : vector<8x8xf32>
    %31 = tpu.matmul %29, %30, %cst_10 {dimension_numbers = #tpu.dot_dimension_numbers<[1], [1], [0], [0], [0, 0, 1, 0], [], []>} : vector<8x8xf32>, vector<8x8xf32>, vector<8x8xf32> -> vector<8x8xf32>
    %cst_11 = arith.constant 0xFF800000 : f32
    %32 = vector.broadcast %cst_11 : f32 to vector<8x8xf32>
    %33 = arith.select %11, %31, %32 : vector<8x8xi1>, vector<8x8xf32>
    %cst_12 = arith.constant dense<0xFF800000> : vector<8xf32>
    %34 = vector.multi_reduction <maximumf>, %33, %cst_12 [1] : vector<8x8xf32> to vector<8xf32>
    %35 = vector.shape_cast %34 : vector<8xf32> to vector<8x1xf32>
    %36 = vector.broadcast %35 : vector<8x1xf32> to vector<8x8xf32>
    %37 = arith.subf %33, %36 : vector<8x8xf32>
    %38 = math.exp %37 : vector<8x8xf32>
    %cst_13 = arith.constant dense<0.000000e+00> : vector<8xf32>
    %39 = vector.multi_reduction <add>, %38, %cst_13 [1] : vector<8x8xf32> to vector<8xf32>
    %40 = vector.shape_cast %39 : vector<8xf32> to vector<8x1xf32>
    %41 = tpu.reciprocal %40 : vector<8x1xf32> -> vector<8x1xf32>
    %42 = vector.broadcast %41 : vector<8x1xf32> to vector<8x8xf32>
    %43 = arith.mulf %38, %42 : vector<8x8xf32>
    %44 = vector.extract_strided_slice %8 {offsets = [0, 8], sizes = [8, 8], strides = [1, 1]} : vector<8x32xf32> to vector<8x8xf32>
    %cst_14 = arith.constant dense<0.000000e+00> : vector<8x8xf32>
    %45 = tpu.matmul %43, %44, %cst_14 {dimension_numbers = #tpu.dot_dimension_numbers<[1], [0], [0], [1], [0, 0, 1, 1], [], []>} : vector<8x8xf32>, vector<8x8xf32>, vector<8x8xf32> -> vector<8x8xf32>
    %46 = vector.extract_strided_slice %6 {offsets = [0, 16], sizes = [8, 8], strides = [1, 1]} : vector<8x32xf32> to vector<8x8xf32>
    %47 = vector.extract_strided_slice %7 {offsets = [0, 16], sizes = [8, 8], strides = [1, 1]} : vector<8x32xf32> to vector<8x8xf32>
    %cst_15 = arith.constant dense<0.000000e+00> : vector<8x8xf32>
    %48 = tpu.matmul %46, %47, %cst_15 {dimension_numbers = #tpu.dot_dimension_numbers<[1], [1], [0], [0], [0, 0, 1, 0], [], []>} : vector<8x8xf32>, vector<8x8xf32>, vector<8x8xf32> -> vector<8x8xf32>
    %cst_16 = arith.constant 0xFF800000 : f32
    %49 = vector.broadcast %cst_16 : f32 to vector<8x8xf32>
    %50 = arith.select %11, %48, %49 : vector<8x8xi1>, vector<8x8xf32>
    %cst_17 = arith.constant dense<0xFF800000> : vector<8xf32>
    %51 = vector.multi_reduction <maximumf>, %50, %cst_17 [1] : vector<8x8xf32> to vector<8xf32>
    %52 = vector.shape_cast %51 : vector<8xf32> to vector<8x1xf32>
    %53 = vector.broadcast %52 : vector<8x1xf32> to vector<8x8xf32>
    %54 = arith.subf %50, %53 : vector<8x8xf32>
    %55 = math.exp %54 : vector<8x8xf32>
    %cst_18 = arith.constant dense<0.000000e+00> : vector<8xf32>
    %56 = vector.multi_reduction <add>, %55, %cst_18 [1] : vector<8x8xf32> to vector<8xf32>
    %57 = vector.shape_cast %56 : vector<8xf32> to vector<8x1xf32>
    %58 = tpu.reciprocal %57 : vector<8x1xf32> -> vector<8x1xf32>
    %59 = vector.broadcast %58 : vector<8x1xf32> to vector<8x8xf32>
    %60 = arith.mulf %55, %59 : vector<8x8xf32>
    %61 = vector.extract_strided_slice %8 {offsets = [0, 16], sizes = [8, 8], strides = [1, 1]} : vector<8x32xf32> to vector<8x8xf32>
    %cst_19 = arith.constant dense<0.000000e+00> : vector<8x8xf32>
    %62 = tpu.matmul %60, %61, %cst_19 {dimension_numbers = #tpu.dot_dimension_numbers<[1], [0], [0], [1], [0, 0, 1, 1], [], []>} : vector<8x8xf32>, vector<8x8xf32>, vector<8x8xf32> -> vector<8x8xf32>
    %63 = vector.extract_strided_slice %6 {offsets = [0, 24], sizes = [8, 8], strides = [1, 1]} : vector<8x32xf32> to vector<8x8xf32>
    %64 = vector.extract_strided_slice %7 {offsets = [0, 24], sizes = [8, 8], strides = [1, 1]} : vector<8x32xf32> to vector<8x8xf32>
    %cst_20 = arith.constant dense<0.000000e+00> : vector<8x8xf32>
    %65 = tpu.matmul %63, %64, %cst_20 {dimension_numbers = #tpu.dot_dimension_numbers<[1], [1], [0], [0], [0, 0, 1, 0], [], []>} : vector<8x8xf32>, vector<8x8xf32>, vector<8x8xf32> -> vector<8x8xf32>
    %cst_21 = arith.constant 0xFF800000 : f32
    %66 = vector.broadcast %cst_21 : f32 to vector<8x8xf32>
    %67 = arith.select %11, %65, %66 : vector<8x8xi1>, vector<8x8xf32>
    %cst_22 = arith.constant dense<0xFF800000> : vector<8xf32>
    %68 = vector.multi_reduction <maximumf>, %67, %cst_22 [1] : vector<8x8xf32> to vector<8xf32>
    %69 = vector.shape_cast %68 : vector<8xf32> to vector<8x1xf32>
    %70 = vector.broadcast %69 : vector<8x1xf32> to vector<8x8xf32>
    %71 = arith.subf %67, %70 : vector<8x8xf32>
    %72 = math.exp %71 : vector<8x8xf32>
    %cst_23 = arith.constant dense<0.000000e+00> : vector<8xf32>
    %73 = vector.multi_reduction <add>, %72, %cst_23 [1] : vector<8x8xf32> to vector<8xf32>
    %74 = vector.shape_cast %73 : vector<8xf32> to vector<8x1xf32>
    %75 = tpu.reciprocal %74 : vector<8x1xf32> -> vector<8x1xf32>
    %76 = vector.broadcast %75 : vector<8x1xf32> to vector<8x8xf32>
    %77 = arith.mulf %72, %76 : vector<8x8xf32>
    %78 = vector.extract_strided_slice %8 {offsets = [0, 24], sizes = [8, 8], strides = [1, 1]} : vector<8x32xf32> to vector<8x8xf32>
    %cst_24 = arith.constant dense<0.000000e+00> : vector<8x8xf32>
    %79 = tpu.matmul %77, %78, %cst_24 {dimension_numbers = #tpu.dot_dimension_numbers<[1], [0], [0], [1], [0, 0, 1, 1], [], []>} : vector<8x8xf32>, vector<8x8xf32>, vector<8x8xf32> -> vector<8x8xf32>
    %80 = tpu.concatenate %28, %45, %62, %79 in 1 : vector<8x8xf32>, vector<8x8xf32>, vector<8x8xf32>, vector<8x8xf32> -> vector<8x32xf32>
    %cst_25 = arith.constant 1.000000e+04 : f32
    %81 = vector.broadcast %cst_25 : f32 to vector<8x32xf32>
    %82 = arith.mulf %80, %81 : vector<8x32xf32>
    %83 = math.roundeven %82 : vector<8x32xf32>
    %cst_26 = arith.constant 9.99999974E-5 : f32
    %84 = vector.broadcast %cst_26 : f32 to vector<8x32xf32>
    %85 = arith.mulf %83, %84 : vector<8x32xf32>
    %c0_27 = arith.constant 0 : index
    %c0_28 = arith.constant 0 : index
    %c0_29 = arith.constant 0 : index
    %86 = vector.load %arg3[%c0_27, %c0_28, %c0_29] : memref<1x8x32xf32, #tpu.memory_space<vmem>>, vector<1x8x32xf32>
    %87 = vector.shape_cast %86 : vector<1x8x32xf32> to vector<8x32xf32>
    %88 = vector.shape_cast %85 : vector<8x32xf32> to vector<1x8x32xf32>
    tpu.vector_store %arg3[%c0_27, %c0_28, %c0_29], %88 {strides = array<i32>} : memref<1x8x32xf32, #tpu.memory_space<vmem>>, vector<1x8x32xf32>,
    return
  }
  func.func @transform_0(%arg0: i32) -> (i32, i32, i32) {
    %c0_i32 = arith.constant 0 : i32
    %c0_i32_0 = arith.constant 0 : i32
    %c0_i32_1 = arith.constant 0 : i32
    return %arg0, %c0_i32, %c0_i32_0 : i32, i32, i32
  }
  func.func @transform_1(%arg0: i32) -> (i32, i32) {
    %c0_i32 = arith.constant 0 : i32
    %c0_i32_0 = arith.constant 0 : i32
    %c0_i32_1 = arith.constant 0 : i32
    return %c0_i32, %c0_i32_0 : i32, i32
  }
  func.func @transform_2(%arg0: i32) -> (i32, i32, i32) {
    %c0_i32 = arith.constant 0 : i32
    %c0_i32_0 = arith.constant 0 : i32
    %c0_i32_1 = arith.constant 0 : i32
    return %arg0, %c0_i32, %c0_i32_0 : i32, i32, i32
  }
}

</mosaic_0001>

<bundles_post_ra>
// kernel: tpu_custom_call.1
= control target key start
LH: loop header
LB: loop body
LE: loop exit
PB: predicated region body
PF: predicated region fallthrough
CT: control target
= control target key end

     0   :  { %7 = vsyncpa [#allocation3], 0  ;;  %s1668_s0 = inlined_call_operand.hbm [shape: f32[2,8,32], index: 0, kind: input, shape index: {}]   ;;  %s1669_s1 = inlined_call_operand.hbm [shape: f32[32,96], index: 1, kind: input, shape index: {}]   ;;  %s1670_s2 = inlined_call_operand.hbm [shape: f32[2,8,32], index: 2, kind: output, shape index: {}]  }
   0x1   :  { %9 = vsyncpa [#allocation3 + $0x1], 0 }
   0x2   :  { %10 = vsyncpa [#allocation6], 0 }
   0x3   :  { %11 = vsyncpa [#allocation4], 0 }
   0x4   :  { %13 = vsyncpa [#allocation4 + $0x1], 0  ;;  %s1404_s9 = smov 0   ;;  %s1406_s10 = smov 0  }
   0x5   :  { %s1408_s11 = smov 0   ;;  %s1410_s12 = smov 0  }
   0x6 LB: > { %s1425_s13 = sadd.s32 4294967295, %s1365_s12   ;;  %s1039_s14 = sadd.s32 4294967294, %s1365_s12   ;;  %s1365_s12 = sphi %s1410_s12, %s1690_s12   ;;  %s1361_s11 = sphi %s1408_s11, %s1689_s11   ;;  %s1357_s10 = sphi %s1406_s10, %s1688_s10   ;;  %s1353_s9 = sphi %s1404_s9, %s1687_s9  }
   0x7   : > { %p39_p0 = scmp.ne.s32.totalorder %s1357_s10, %s1353_s9  ;;  %p1671_p1 = scmp.eq.s32.totalorder %s1425_s13, 0 }
   0x8   : > { %p90_p3 = scmp.eq.s32.totalorder %s1039_s14, 1  ;;  %p1040_p5 = scmp.ge.s32.totalorder %s1365_s12, 1 }
   0x9   : > { %p1434_p4 = por %p1671_p1, %p39_p0  ;;  %p97_p7 = scmp.lt.s32.totalorder %s1365_s12, 3 }
   0xa   : > { %p1439_p6 = por %p90_p3, %p39_p0  ;;  %s1367_s18 = smov [#allocation5]  }
   0xb   : > { %s1674_s15 = scalar_select %p1434_p4, 1, 0 }
   0xc   : > { %s1675_s16 = scalar_select %p1439_p6, 1, 0 }
   0xd   : > { %p1444_p8 = pnand %p1040_p5, %p97_p7  ;;  %s109_s19 = sshll.u32 %s1367_s18, 4  ;;  %s1448_s19 = int_to_ptr.vmem [resolvable:$true] %s109_s19 }
   0xe   : > { %s1460_s21 = sadd.s32 1, %s1365_s12   ;;  %s26_s22 = sadd.s32 1, %s1361_s11 }
   0xf   : > { %s1676_s17 = scalar_select %p1444_p8, 1, 0 }
  0x10   : > { %p1153_p9 = pneg %p1444_p8  ;;  %s23_s23 = ssub.s32 %s1365_s12, %s1460_s21 }
  0x11   : > { %s1237_s26 = scalar_lea.hbm %s1669_s1, 512 }
  0x12   : > { %p1455_p11 = pnand %p1153_p9, %p1671_p1  ;;  %p1238_p12 = scmp.ne.s32.totalorder %s1669_s1, %s1237_s26 }
  0x13   : > { %p1244_p5 = scmp.lt.u32.totalorder %s1237_s26, %s1669_s1 }
  0x14   : > { %p1239_p13 = pneg %p1455_p11 }
  0x16   : > { %p1240_p0 = pnand %p1239_p13, %p1238_p12 }
  0x18   : > { %p1241_p3 = pneg %p1240_p0 }
  0x1a   : > { %p1246_p7 = pnand %p1244_p5, %p1241_p3 }
  0x1c   : > { %1249 = shalt.err (!%p1246_p7)
}
  0x1d   : > { %s1250_s3 = scalar_lea.vmem %s1448_s19, 512  ;;  %p1258_p2 = scmp.lt.s32.totalorder %s1448_s19, %s1448_s19 }
  0x1e   : > { %p1251_p9 = scmp.ne.s32.totalorder %s1448_s19, %s1250_s3  ;;  %p1259_p6 = scmp.lt.s32.totalorder %s1250_s3, %s1250_s3 }
  0x20   : > { %p1253_p10 = pnand %p1251_p9, %p1239_p13  ;;  %p1260_p4 = por %p1259_p6, %p1258_p2 }
  0x22   : > { %p1254_p1 = pneg %p1253_p10 }
  0x24   : > { %p1261_p8 = pnand %p1260_p4, %p1254_p1 }
  0x26   : > { %1264 = shalt.err (!%p1261_p8)
}
  0x27   : > { %s1368_s4 = smov 128   ;;  %s1369_s5 = smov 8  }
  0x28   : > { %1156 = dma.hbm_to_vmem [thread:$0]  (!%p1455_p11), %s1669_s1, 512, %s1448_s19, [#allocation6], %s1368_s4, %s1368_s4, %s1369_s5  }
  0x29   : > { %p24_p2 = scmp.eq.s32.totalorder %s23_s23, 0  ;;  %p33_p1 = scmp.ne.s32.totalorder %s1361_s11, %s1357_s10 }
  0x2a   : > { %p34_p4 = scmp.eq.s32.totalorder %s1365_s12, 0  ;;  %p1166_p6 = scmp.lt.s32.totalorder %s1365_s12, 2 }
  0x2b   : > { %s1491_s8 = scalar_select %p24_p2, %s1361_s11, %s26_s22  }
  0x2c   : > { %p35_p8 = por %p34_p4, %p33_p1  ;;  %p1678_p10 = scmp.eq.s32.totalorder %s1425_s13, 1 }
  0x2d   : > { %s123_s18 = sand.u32 1, %s1361_s11   ;;  %s1044_s24 = sshll.u32 %s1365_s12, 7 }
  0x2e   : > { %p1495_p12 = por %p1678_p10, %p33_p1  ;;  %s1043_s25 = sshll.u32 %s123_s18, 3 }
  0x2f   : > { %s1504_s27 = scalar_lea.hbm %s1668_s0, %s1044_s24  ;;  %s127_s19 = scalar_lea.vmem [#allocation2], %s1043_s25 }
  0x30   : > { %s134_s22 = sshll.u32 %s127_s19, 4  ;;  %p1506_p11 = pnand %p1166_p6, %p35_p8  ;;  %s1510_s22 = int_to_ptr.vmem [resolvable:$true] %s134_s22 }
  0x31   : > { %s124_s28 = scalar_lea.sflag [#allocation3], %s123_s18  ;;  %s1265_s29 = scalar_lea.hbm %s1504_s27, 128 }
  0x32   : > { %p1266_p13 = scmp.ne.s32.totalorder %s1504_s27, %s1265_s29  ;;  %p1267_p0 = pneg %p1506_p11 }
  0x33   : > { %s1270_s4 = scalar_lea.hbm %s1668_s0, 256  ;;  %p1271_p7 = scmp.lt.u32.totalorder %s1504_s27, %s1668_s0 }
  0x34   : > { %p1268_p3 = pnand %p1267_p0, %p1266_p13  ;;  %p1272_p9 = scmp.lt.u32.totalorder %s1270_s4, %s1265_s29 }
  0x35   : > { %p1274_p1 = scmp.lt.u32.totalorder %s1265_s29, %s1504_s27 }
  0x36   : > { %p1269_p5 = pneg %p1268_p3  ;;  %p1273_p2 = por %p1272_p9, %p1271_p7 }
  0x38   : > { %p1275_p4 = por %p1274_p1, %p1273_p2 }
  0x3a   : > { %p1276_p6 = pnand %p1275_p4, %p1269_p5 }
  0x3c   : > { %1279 = shalt.err (!%p1276_p6)
}
  0x3d   : > { %s1280_s7 = scalar_lea.vmem %s1510_s22, 128  ;;  %s1370_s18 = smov [#allocation2]  }
  0x3e   : > { %p1281_p8 = scmp.ne.s32.totalorder %s1510_s22, %s1280_s7  ;;  %s1285_s24 = sshll.u32 %s1370_s18, 4  ;;  %s1286_s24 = int_to_ptr.vmem [resolvable:$false] %s1285_s24 }
  0x3f   : > { %s1287_s25 = scalar_lea.vmem %s1286_s24, 256  ;;  %p1288_p3 = scmp.lt.s32.totalorder %s1510_s22, %s1286_s24 }
  0x40   : > { %p1283_p10 = pnand %p1281_p8, %p1267_p0  ;;  %p1289_p7 = scmp.lt.s32.totalorder %s1287_s25, %s1280_s7 }
  0x42   : > { %p1284_p13 = pneg %p1283_p10  ;;  %p1290_p9 = por %p1289_p7, %p1288_p3 }
  0x44   : > { %p1291_p2 = pnand %p1290_p9, %p1284_p13 }
  0x46   : > { %1294 = shalt.err (!%p1291_p2)
}
  0x47   : > { %1160 = dma.hbm_to_vmem [thread:$0]  (!%p1506_p11), %s1504_s27, 128, %s1510_s22, %s124_s28  }
  0x48   : > { %p1681_p5 = scmp.ne.s32.totalorder %s1676_s17, 0 }
  0x49   : > { %s1540_s20 = sand.u32 (!%p1681_p5), 1, %s1357_s10   ;;  %p1682_p0 = scmp.ne.s32.totalorder (!%p1681_p5), %s1674_s15, 0 }
  0x4a   : > { %143 = sbr.rel (%p1681_p5) target bundleno = 1357 (0x54d), region = 28  ;;  %s1046_s26 = sshll.u32 (!%p1681_p5), %s1540_s20, 3 }
  0x4b   : > { %s146_s19 = scalar_lea.sflag (!%p1681_p5), [#allocation3], %s1540_s20  ;;  %s149_s29 = scalar_lea.vmem (!%p1681_p5), [#allocation2], %s1046_s26 }
  0x51   : > { %1340 = dma.done.wait (%p1682_p0), %s146_s19, 128  }
  0x52   : > { %1342 = vsyncadd (%p1682_p0), %s146_s19, 4294967168  ;;  %p1683_p11 = scmp.eq.s32.totalorder %s1425_s13, 0 }
  0x54   : > { %1344 = dma.done.wait (%p1683_p11), [#allocation6], 512   ;;  %p1684_p1 = pmov %p1683_p11 }
  0x55   : > { %v1371_v0 = vmov 0.0|0.0   ;;  %vm1372_vm0 = vmmov 0   ;;  %v1373_v1 = vmov 0.0   ;;  %v175_v2 = vld [vmem:[#allocation5] sm:$0xff]  ;;  %v176_v3 = vld [vmem:[#allocation5 + $0x8] sm:$0xff]  ;;  %v177_v4 = vld [vmem:[#allocation5 + $0x10] sm:$0xff]  ;;  %v254_v19 = vlaneseq }
  0x56   : > { %1346 = vsyncadd (%p1684_p1), [#allocation6], 4294966784  ;;  %1138 = vmatprep.subr.bf16.mxu0 %v1371_v0  ;;  %1095 = vmatprep.mubr.msk.f32.mxu0 %vm1372_vm0, %v1373_v1  ;;  %v1139_v5 = vpack.c.bf16 %v176_v3, %v175_v2  ;;  %v178_v6 = vld [vmem:[#allocation5 + $0x18] sm:$0xff]  ;;  %vm179_vm1 = vcmask 261120   ;;  %s1374_s15 = smov 96   ;;  %s1375_s17 = smov 120  }
  0x57   : > { %1098 = vmatprep.subr.mxu1 %v1373_v1  ;;  %1100 = vmatprep.mubr.msk.f32.mxu1 %vm1372_vm0, %v1373_v1  ;;  %v1142_v7 = vpack.c.bf16 %v178_v6, %v177_v4  ;;  %v174_v8 = vld [vmem:[%s149_s29] sm:$0xff]  ;;  %s1376_s27 = smov 88   ;;  %s1377_s22 = smov 80   ;;  %vm262_vm2 = vcmask 64512   ;;  %v255_v20 = vshrl.u32 %v254_v19, 7  ;;  %v257_v21 = vand.u32 127, %v254_v19 }
  0x58   : > { %1140 = vmatpush3.bf16.msra.mxu0 %v1139_v5  ;;  %s1378_s23 = smov 112   ;;  %s1379_s28 = smov 72   ;;  %vm937_vm4 = vcmask 130048   ;;  %vm939_vm5 = vcmask 195584  }
  0x59   : > { %1141 = vmatprep.subr.bf16.mxu0 %v1371_v0  ;;  %s1380_s30 = smov 104   ;;  %vm258_vm3 = vcmp.le.s32.totalorder %v257_v21, %v255_v20  ;;  %s1381_s3 = smov 56  }
  0x5a   : > { %s1382_s4 = smov 64   ;;  %s1383_s5 = smov 48  }
  0x5b   : > { %s1384_s6 = smov 40   ;;  %s1385_s7 = smov 8  }
  0x5c   : > { %1143 = vmatpush3.bf16.msra.mxu0 %v1142_v7  ;;  %s1386_s18 = smov 16   ;;  %s1387_s24 = smov 24  }
  0x5d   : > { %1108 = vmatprep.subr.mxu0 %v1373_v1  ;;  %s1063_s25 = sshll.u32 %s1425_s13, 7  ;;  %s173_s19 = scalar_lea.vmem [#allocation7], %s1046_s26 }
  0x5e   : > { %s959_s29 = sshll.u32 %s173_s19, 4  ;;  %s1388_s13 = smov [#allocation7]   ;;  %s1625_s29 = int_to_ptr.vmem [resolvable:$true] %s959_s29 }
  0x5f   : > { %1096 = vmatmul.mubr.msk.f32.vlgmr.msra.gmra.mrb[0].mxu0 %vm179_vm1, %v174_v8  ;;  %s1299_s26 = sshll.u32 %s1388_s13, 4  ;;  %s1300_s26 = int_to_ptr.vmem [resolvable:$false] %s1299_s26 }
  0x60   : > { %1110 = vmatprep.mubr.msk.f32.mxu0 %vm1372_vm0, %v1373_v1  ;;  %p1302_p10 = scmp.lt.s32.totalorder %s1625_s29, %s1300_s26 }
 0x132   : > { %v1563_v9 = vpop.f32.mrb[0].mxu0 }
 0x133   : > { %260 = vrot.lane.b32.xlu0 %v1563_v9, %s1374_s15  ;;  %v1097_v10 = vpop.f32.mrb[1].mxu0  ;;  %v253_v11 = vmul.f32 0.35355338, %v1563_v9 }
 0x135   : > { %426 = vrot.lane.b32.xlu1 %v253_v11, %s1375_s17 }
 0x137   : > { %428 = vrot.lane.b32.xlu0 %v1563_v9, %s1376_s27  ;;  %s1623_s27 = scalar_lea.hbm %s1670_s2, %s1063_s25 }
 0x139   : > { %594 = vrot.lane.b32.xlu1 %v1563_v9, %s1377_s22  ;;  %s946_s22 = scalar_lea.sflag [#allocation4], %s1540_s20 }
 0x13b   : > { %592 = vrot.lane.b32.xlu0 %v253_v11, %s1378_s23  ;;  %s1295_s23 = scalar_lea.vmem %s1625_s29, 128 }
 0x13c   : > { %p1296_p4 = scmp.ne.s32.totalorder %s1625_s29, %s1295_s23 }
 0x13d   : > { %760 = vrot.lane.b32.xlu1 %v1563_v9, %s1379_s28  ;;  %s1301_s28 = scalar_lea.vmem %s1300_s26, 256 }
 0x13e   : > { %p1297_p6 = pnand %p1296_p4, %p1495_p12  ;;  %p1303_p13 = scmp.lt.s32.totalorder %s1301_s28, %s1295_s23 }
 0x13f   : > { %758 = vrot.lane.b32.xlu0 %v253_v11, %s1380_s30 }
 0x140   : > { %p1298_p8 = pneg %p1297_p6  ;;  %p1304_p3 = por %p1303_p13, %p1302_p10 }
 0x142   : > { %p1305_p7 = pnand %p1304_p3, %p1298_p8 }
 0x1a5   : > { %v261_v12 = vpop.permute.xlu0 %260 }
 0x1a6   : > { %1099 = vmatpush3.xpose.msk.msra.mxu1 %vm262_vm2, %v261_v12 }
 0x1a7   : > { %v427_v13 = vpop.permute.xlu1 %426  ;;  %1103 = vmatprep.subr.mxu1 %v1373_v1 }
 0x1a9   : > { %v429_v14 = vpop.permute.xlu0 %428  ;;  %1101 = vmatmul.mubr.msk.f32.vlgmr.msra.gmra.mrb[0].mxu1 %vm262_vm2, %v253_v11 }
 0x1aa   : > { %1109 = vmatpush3.xpose.msk.msra.mxu0 %vm262_vm2, %v429_v14  ;;  %1105 = vmatprep.mubr.msk.f32.mxu1 %vm1372_vm0, %v1373_v1 }
 0x1ab   : > { %v595_v15 = vpop.permute.xlu1 %594  ;;  %1118 = vmatprep.subr.mxu0 %v1373_v1 }
 0x1ad   : > { %1111 = vmatmul.mubr.msk.f32.vlgmr.msra.gmra.mrb[2].mxu0 %vm262_vm2, %v427_v13  ;;  %v593_v16 = vpop.permute.xlu0 %592 }
 0x1ae   : > { %1119 = vmatpush3.xpose.msk.msra.mxu0 %vm262_vm2, %v595_v15  ;;  %1120 = vmatprep.mubr.msk.f32.mxu0 %vm1372_vm0, %v1373_v1 }
 0x1af   : > { %1128 = vmatprep.subr.mxu0 %v1373_v1  ;;  %v761_v17 = vpop.permute.xlu1 %760 }
 0x1b1   : > { %1121 = vmatmul.mubr.msk.f32.vlgmr.msra.gmra.mrb[4].mxu0 %vm262_vm2, %v593_v16  ;;  %v759_v18 = vpop.permute.xlu0 %758 }
 0x1b2   : > { %1129 = vmatpush3.xpose.msk.msra.mxu0 %vm262_vm2, %v761_v17  ;;  %1130 = vmatprep.mubr.msk.f32.mxu0 %vm1372_vm0, %v1373_v1 }
 0x1b5   : > { %1131 = vmatmul.mubr.msk.f32.vlgmr.msra.gmra.mrb[6].mxu0 %vm262_vm2, %v759_v18 }
 0x27c   : > { %v334_v22 = vpop.f32.mrb[0].mxu1 }
 0x27d   : > { %v338_v23 = vsel %vm258_vm3, %v334_v22, -inf  ;;  %v1102_v24 = vpop.f32.mrb[1].mxu1 }
 0x27e   : > { %v339_v25 = vsel %vm262_vm2, %v338_v23, -inf }
 0x27f   : > { %340 = vmax.xlane.f32.xlu1 %v339_v25 }
 0x280   : > { %v500_v26 = vpop.f32.mrb[2].mxu0 }
 0x281   : > { %v504_v27 = vsel %vm258_vm3, %v500_v26, -inf  ;;  %v1112_v28 = vpop.f32.mrb[3].mxu0 }
 0x282   : > { %v505_v29 = vsel %vm262_vm2, %v504_v27, -inf }
 0x283   : > { %506 = vmax.xlane.f32.xlu0 %v505_v29 }
 0x284   : > { %v666_v30 = vpop.f32.mrb[4].mxu0 }
 0x285   : > { %v670_v31 = vsel %vm258_vm3, %v666_v30, -inf  ;;  %v1122_v32 = vpop.f32.mrb[5].mxu0 }
 0x286   : > { %v671_v33 = vsel %vm262_vm2, %v670_v31, -inf }
 0x287   : > { %672 = vmax.xlane.f32.xlu0 %v671_v33 }
 0x288   : > { %v832_v34 = vpop.f32.mrb[6].mxu0 }
 0x289   : > { %v836_v35 = vsel %vm258_vm3, %v832_v34, -inf  ;;  %v1132_v36 = vpop.f32.mrb[7].mxu0 }
 0x28a   : > { %v837_v37 = vsel %vm262_vm2, %v836_v35, -inf }
 0x28b   : > { %838 = vmax.xlane.f32.xlu1 %v837_v37 }
 0x29c   : > { %516 = vrot.lane.b32.xlu1 %v1563_v9, %s1381_s3 }
 0x30c   : > { %v341_v38 = vpop.xlane.xlu1 %340 }
 0x30d   : > { %v342_v39 = vsub.f32 %v338_v23, %v341_v38 }
 0x30f   : > { %v343_v40 = vmul.f32 1.442695, %v342_v39 }
 0x310   : > { %v507_v41 = vpop.xlane.xlu0 %506 }
 0x311   : > { %1221 = vpow2.f32 %v343_v40  ;;  %v508_v42 = vsub.f32 %v504_v27, %v507_v41 }
 0x313   : > { %v509_v43 = vmul.f32 1.442695, %v508_v42 }
 0x314   : > { %v673_v53 = vpop.xlane.xlu0 %672 }
 0x315   : > { %1223 = vpow2.f32 %v509_v43  ;;  %v674_v54 = vsub.f32 %v670_v31, %v673_v53 }
 0x317   : > { %v675_v55 = vmul.f32 1.442695, %v674_v54 }
 0x318   : > { %v839_v44 = vpop.xlane.xlu1 %838 }
 0x319   : > { %v840_v45 = vsub.f32 %v836_v35, %v839_v44 }
 0x31b   : > { %v1222_v46 = vpop.eup %1221  ;;  %v841_v47 = vmul.f32 1.442695, %v840_v45 }
 0x31c   : > { %v345_v48 = vsel %vm262_vm2, %v1222_v46, 0.0  ;;  %v517_v58 = vpop.permute.xlu1 %516 }
 0x31d   : > { %1225 = vpow2.f32 %v841_v47  ;;  %346 = vadd.xlane.f32.xlu0 %v345_v48 }
 0x31e   : > { %1227 = vpow2.f32 %v675_v55 }
 0x31f   : > { %v1224_v49 = vpop.eup %1223 }
 0x320   : > { %v511_v50 = vsel %vm262_vm2, %v1224_v49, 0.0 }
 0x321   : > { %512 = vadd.xlane.f32.xlu1 %v511_v50 }
 0x327   : > { %v1226_v51 = vpop.eup %1225 }
 0x328   : > { %v843_v52 = vsel %vm262_vm2, %v1226_v51, 0.0  ;;  %v1228_v56 = vpop.eup %1227 }
 0x329   : > { %844 = vadd.xlane.f32.xlu1 %v843_v52  ;;  %v677_v57 = vsel %vm262_vm2, %v1228_v56, 0.0 }
 0x333   : > { %350 = vrot.lane.b32.xlu0 %v1563_v9, %s1382_s4 }
 0x33a   : > { %682 = vrot.lane.b32.xlu1 %v1563_v9, %s1383_s5 }
 0x352   : > { %678 = vadd.xlane.f32.xlu0 %v677_v57 }
 0x368   : > { %848 = vrot.lane.b32.xlu0 %v1563_v9, %s1384_s6 }
 0x3aa   : > { %v347_v59 = vpop.xlane.xlu0 %346 }
 0x3ab   : > { %1229 = vrcp.f32 %v347_v59 }
 0x3ae   : > { %v351_v60 = vpop.permute.xlu0 %350  ;;  %v513_v61 = vpop.xlane.xlu1 %512 }
 0x3af   : > { %1231 = vrcp.f32 %v513_v61  ;;  %1104 = vmatpush3.msra.mxu1 %v351_v60 }
 0x3b0   : > { %1113 = vmatprep.subr.mxu1 %v1373_v1 }
 0x3b5   : > { %v1230_v62 = vpop.eup %1229 }
 0x3b6   : > { %v349_v63 = vmul.f32 %v1230_v62, %v1222_v46  ;;  %v845_v0 = vpop.xlane.xlu1 %844 }
 0x3b8   : > { %1106 = vmatmul.mubr.msk.f32.vlgmr.msra.gmra.mrb[2].mxu1 %vm262_vm2, %v349_v63 }
 0x3b9   : > { %v1232_v2 = vpop.eup %1231  ;;  %1114 = vmatpush3.msra.mxu1 %v517_v58  ;;  %1115 = vmatprep.mubr.msk.f32.mxu1 %vm1372_vm0, %v1373_v1 }
 0x3ba   : > { %v515_v3 = vmul.f32 %v1232_v2, %v1224_v49  ;;  %v683_v4 = vpop.permute.xlu1 %682  ;;  %1123 = vmatprep.subr.mxu1 %v1373_v1 }
 0x3bc   : > { %1116 = vmatmul.mubr.msk.f32.vlgmr.msra.gmra.mrb[4].mxu1 %vm262_vm2, %v515_v3 }
 0x3bd   : > { %1124 = vmatpush3.msra.mxu1 %v683_v4  ;;  %1125 = vmatprep.mubr.msk.f32.mxu1 %vm1372_vm0, %v1373_v1 }
 0x3be   : > { %1133 = vmatprep.subr.mxu1 %v1373_v1 }
 0x3df   : > { %v679_v5 = vpop.xlane.xlu0 %678 }
 0x3e0   : > { %1233 = vrcp.f32 %v679_v5 }
 0x3e1   : > { %1235 = vrcp.f32 %v845_v0 }
 0x3e3   : > { %v849_v9 = vpop.permute.xlu0 %848 }
 0x3ea   : > { %v1234_v6 = vpop.eup %1233 }
 0x3eb   : > { %v681_v7 = vmul.f32 %v1234_v6, %v1228_v56  ;;  %v1236_v8 = vpop.eup %1235 }
 0x3ec   : > { %v847_v10 = vmul.f32 %v1236_v8, %v1226_v51 }
 0x3ed   : > { %1126 = vmatmul.mubr.msk.f32.vlgmr.msra.gmra.mrb[6].mxu1 %vm262_vm2, %v681_v7 }
 0x3ee   : > { %1134 = vmatpush3.msra.mxu1 %v849_v9  ;;  %1135 = vmatprep.mubr.msk.f32.mxu1 %vm1372_vm0, %v1373_v1 }
 0x3f1   : > { %1136 = vmatmul.mubr.msk.f32.vlgmr.msra.gmra.mrb[8].mxu1 %vm262_vm2, %v847_v10 }
 0x48b   : > { %v422_v11 = vpop.f32.mrb[2].mxu1 }
 0x48c   : > { %v1107_v12 = vpop.f32.mrb[3].mxu1 }
 0x48f   : > { %v588_v13 = vpop.f32.mrb[4].mxu1 }
 0x490   : > { %925 = vrot.lane.b32.xlu1 %v588_v13, %s1385_s7  ;;  %v1117_v14 = vpop.f32.mrb[5].mxu1 }
 0x4c0   : > { %v754_v15 = vpop.f32.mrb[6].mxu1 }
 0x4c1   : > { %929 = vrot.lane.b32.xlu0 %v754_v15, %s1386_s18  ;;  %v1127_v16 = vpop.f32.mrb[7].mxu1 }
 0x4c4   : > { %v920_v17 = vpop.f32.mrb[8].mxu1 }
 0x4c5   : > { %933 = vrot.lane.b32.xlu1 %v920_v17, %s1387_s24  ;;  %v1137_v18 = vpop.f32.mrb[9].mxu1 }
 0x502   : > { %v926_v1 = vpop.permute.xlu1 %925 }
 0x503   : > { %v936_v20 = vsel %vm262_vm2, %v422_v11, %v926_v1 }
 0x533   : > { %v930_v19 = vpop.permute.xlu0 %929 }
 0x534   : > { %v938_v21 = vsel %vm937_vm4, %v936_v20, %v930_v19 }
 0x537   : > { %v934_v22 = vpop.permute.xlu1 %933 }
 0x538   : > { %v940_v23 = vsel %vm939_vm5, %v938_v21, %v934_v22 }
 0x539   : > { %v941_v24 = vmul.f32 10000.0, %v940_v23 }
 0x53b   : > { %v1144_v25 = vround.rtne.f32 %v941_v24 }
 0x53d   : > { %v943_v26 = vmul.f32 0.0001, %v1144_v25 }
 0x53f   : > { %944 = vst.msk [vmem:[%s173_s19] sm:$0xff] %vm179_vm1, %v943_v26 }
 0x540   : > { %1308 = shalt.err (!%p1305_p7)
}
 0x541   : > { %s1309_s20 = scalar_lea.hbm %s1623_s27, 128  ;;  %s1313_s4 = scalar_lea.hbm %s1670_s2, 256 }
 0x542   : > { %p1310_p9 = scmp.ne.s32.totalorder %s1623_s27, %s1309_s20  ;;  %p1314_p0 = scmp.lt.u32.totalorder %s1623_s27, %s1670_s2 }
 0x543   : > { %p1315_p11 = scmp.lt.u32.totalorder %s1313_s4, %s1309_s20  ;;  %p1317_p4 = scmp.lt.u32.totalorder %s1309_s20, %s1623_s27 }
 0x544   : > { %p1311_p2 = pnand %p1310_p9, %p1495_p12 }
 0x545   : > { %p1316_p1 = por %p1315_p11, %p1314_p0 }
 0x546   : > { %p1312_p5 = pneg %p1311_p2 }
 0x547   : > { %p1318_p6 = por %p1317_p4, %p1316_p1 }
 0x549   : > { %p1319_p8 = pnand %p1318_p6, %p1312_p5 }
 0x54b   : > { %1322 = shalt.err (!%p1319_p8)
}
 0x54c   : > { %1151 = dma.vmem_to_hbm [thread:$0]  (%p1495_p12), %s1625_s29, 128, %s1623_s27, %s946_s22  }
 0x54d PF: > { %s971_s7 = sand.u32 1, %s1353_s9   ;;  %p1685_p10 = scmp.ne.s32.totalorder %s1675_s16, 0 }
 0x54e   : > { %p1686_p13 = scmp.ge.s32.totalorder %s1365_s12, 2  ;;  %s972_s18 = scalar_lea.sflag [#allocation4], %s971_s7 }
 0x550   : > { %p1162_p3 = pnand %p1686_p13, %p1685_p10 }
 0x552   : > { %1348 = dma.done.wait (!%p1162_p3), %s972_s18, 128  }
 0x553   : > { %1350 = vsyncadd (!%p1162_p3), %s972_s18, 4294967168  ;;  %p16_p7 = scmp.ge.s32.totalorder %s1460_s21, 4   ;;  %s1687_s9 = smov %s1357_s10 }
 0x554   : > { %s1688_s10 = smov %s1361_s11  ;;  %s1689_s11 = smov %s1491_s8 }
 0x555   : > { %s1690_s12 = smov %s1460_s21  ;;  %18 = sbr.rel (!%p16_p7) target bundleno = 6 (0x6), region = 77 }
 0x55c   :  { %977 = vsyncpa [#allocation3], 1 }
 0x55d   :  { %979 = vsyncpa [#allocation3 + $0x1], 1 }
 0x55e   :  { %980 = vsyncpa [#allocation6], 1 }
 0x55f   :  { %981 = vsyncpa [#allocation4], 1 }
 0x560   :  { %983 = vsyncpa [#allocation4 + $0x1], 1 }

</bundles_post_ra>
